<compile_context>
chip_gen: v7x
topology: tpu7x:2x2x1
jax: 0.10.0
libtpu: 0.0.40
codegen_flags: <defaults>
</compile_context>

<pallas_src>
import functools

import jax
import jax.numpy as jnp
from jax.experimental import pallas as pl
from jax.experimental.pallas import tpu as pltpu


_GRAY_COEFFS = (65.738 / 256.0, 129.057 / 256.0, 25.064 / 256.0)


def _grad_kernel(x_ref, m_ref, o_ref, pad_ref, *, C, HW, W):
    """x_ref: (BN, C*HW)  m_ref: (2, HW)  o_ref: (BN, HW)  pad_ref: (BN, HW+2W)."""
    bn = pad_ref.shape[0]

    # --- gray conversion (GradLayer.get_gray, applied only when C == 3) ---
    # Channels live at static lane offsets c*HW of the dense (bn, C*HW) block.
    if C == 3:
        c0, c1, c2 = _GRAY_COEFFS
        gray = (x_ref[:, 0:HW].astype(jnp.float32) * c0
                + x_ref[:, HW:2 * HW].astype(jnp.float32) * c1
                + x_ref[:, 2 * HW:3 * HW].astype(jnp.float32) * c2)
    else:  # C == 1: the convs are applied to x directly.
        gray = x_ref[:, 0:HW].astype(jnp.float32)

    # Zero only the two W-wide halo stripes (== conv2d zero padding for the
    # +-W shifts and the first/last element of the +-1 shifts).  Every step,
    # not once: see module docstring (megacore scratch-init hazard).
    # Correctness relies on (a) the interior [W, W+HW) being fully
    # overwritten every step and (b) the halo never being written elsewhere.
    zeros_stripe = jnp.zeros((bn, W), jnp.float32)
    pad_ref[:, 0:W] = zeros_stripe
    pad_ref[:, W + HW:W + HW + W] = zeros_stripe
    pad_ref[:, W:W + HW] = gray

    # kernel_v = [[0,-1,0],[0,0,0],[0,1,0]]  ->  x_v[i,j] = x[i+1,j] - x[i-1,j]
    up = pad_ref[:, 0:HW]                    # gray[k - W]  (0 above row 0)
    down = pad_ref[:, 2 * W:2 * W + HW]      # gray[k + W]  (0 below row H-1)
    x_v = down - up

    # kernel_h = [[0,0,0],[-1,0,1],[0,0,0]]  ->  x_h[i,j] = x[i,j+1] - x[i,j-1]
    # The +-1 lane shifts wrap across image rows; mask j==W-1 / j==0 to zero.
    right = pad_ref[:, W + 1:W + 1 + HW] * m_ref[0:1, :]
    left = pad_ref[:, W - 1:W - 1 + HW] * m_ref[1:2, :]
    x_h = right - left

    o_ref[...] = jnp.sqrt(x_v * x_v + x_h * x_h + 1e-6).astype(o_ref.dtype)


def _vmem_capacity_bytes():
    """Physical VMEM per TensorCore; fall back to the v7x value (64 MiB)."""
    try:
        cap = getattr(pltpu.get_tpu_info(), "vmem_capacity_bytes", None)
        if cap:
            return int(cap)
    except Exception:
        pass
    return 64 * 1024 * 1024


def _pick_block_n(N, in_per_img, footprint_fn, vmem_budget):
    """Images per grid step.
      * Output/input block sublane dim (bn) must be a multiple of 8 or == N.
      * Fit the double-buffered footprint inside the VMEM budget.
      * Prefer a grid length >= 2 so the 'parallel' axis can shard across
        TensorCores on v7x.
      * Prefer input blocks of ~2-16 MiB to amortize per-step pipeline
        overhead (the kernel is HBM-bandwidth bound)."""
    cands = [bn for bn in range(1, N + 1)
             if N % bn == 0 and (bn % 8 == 0 or bn == N)]
    fitting = [bn for bn in cands if footprint_fn(bn) <= vmem_budget]
    if not fitting:
        # TODO(synk): row-tile very large images (see module docstring).
        return min(cands)
    multi = [bn for bn in fitting if N // bn >= 2]
    pool = multi if multi else fitting
    target, cap = 2 * 1024 * 1024, 16 * 1024 * 1024
    good = [bn for bn in pool if target <= bn * in_per_img <= cap]
    if good:
        return min(good)              # smallest block hitting target -> longest grid
    under = [bn for bn in pool if bn * in_per_img < target]
    if under:
        return max(under)
    return min(pool)


def grad_layer(x):
    """x: (N, C, H, W), C in {1, 3}.  Returns (N, 1, H, W) = GradLayer(x)."""
    N, C, H, W = x.shape
    assert C in (1, 3), "GradLayer expects 1- or 3-channel NCHW input"
    HW = H * W

    # Lane-dense layout: fold (C, H, W) into a single trailing axis C*H*W so
    # the block's sublane dim is bn (>= 8) rather than C (padded to 8).
    x_flat = x.reshape(N, C * HW)

    # Host-precomputed horizontal-boundary masks (kept VMEM-resident):
    #   row 0: 1 where a right neighbour exists (j != W-1)
    #   row 1: 1 where a left  neighbour exists (j != 0)
    j = jnp.arange(HW, dtype=jnp.int32) % W
    masks = jnp.stack([(j != (W - 1)), (j != 0)]).astype(jnp.float32)

    itemsize = jnp.dtype(x.dtype).itemsize
    in_per_img = C * HW * itemsize
    out_per_img = HW * itemsize
    scr_per_img = (HW + 2 * W) * 4
    mask_bytes = 2 * HW * 4

    def footprint(bn):
        # 2x double-buffered in/out blocks + persistent scratch + resident mask.
        return bn * (2 * in_per_img + 2 * out_per_img + scr_per_img) + 2 * mask_bytes

    vmem_cap = _vmem_capacity_bytes()
    bn = _pick_block_n(N, in_per_img, footprint, int(0.75 * vmem_cap))
    grid = (N // bn,)
    vmem_limit = int(min(0.9 * vmem_cap,
                         max(32 * 1024 * 1024, 1.5 * footprint(bn))))

    kernel = functools.partial(_grad_kernel, C=C, HW=HW, W=W)
    out_flat = pl.pallas_call(
        kernel,
        out_shape=jax.ShapeDtypeStruct((N, HW), x.dtype),
        grid_spec=pltpu.PrefetchScalarGridSpec(
            num_scalar_prefetch=0,
            grid=grid,
            in_specs=[
                pl.BlockSpec((bn, C * HW), lambda n: (n, 0)),
                pl.BlockSpec((2, HW), lambda n: (0, 0)),
            ],
            out_specs=pl.BlockSpec((bn, HW), lambda n: (n, 0)),
            scratch_shapes=[pltpu.VMEM((bn, HW + 2 * W), jnp.float32)],
        ),
        compiler_params=pltpu.CompilerParams(
            dimension_semantics=("parallel",),
            vmem_limit_bytes=vmem_limit,
        ),
    )(x_flat, masks)

    return out_flat.reshape(N, 1, H, W)


def _reference(x):
    # Pure-JAX reference of the PyTorch forward, for a correctness check.
    if x.shape[1] == 3:
        coeffs = jnp.array([65.738, 129.057, 25.064], jnp.float32) / 256.0
        x = (x * coeffs[None, :, None, None]).sum(axis=1, keepdims=True)
    pad = jnp.pad(x, ((0, 0), (0, 0), (1, 1), (1, 1)))
    x_v = pad[:, :, 2:, 1:-1] - pad[:, :, :-2, 1:-1]
    x_h = pad[:, :, 1:-1, 2:] - pad[:, :, 1:-1, :-2]
    return jnp.sqrt(x_v * x_v + x_h * x_h + 1e-6)


if __name__ == "__main__":
    key = jax.random.PRNGKey(0)
    k3, k1 = jax.random.split(key)

    x3 = jax.random.uniform(k3, (2, 3, 16, 16), dtype=jnp.float32)
    out3 = jax.block_until_ready(grad_layer(x3))
    assert out3.shape == (2, 1, 16, 16)
    assert jnp.allclose(out3, _reference(x3), atol=1e-5, rtol=1e-5)

    x1 = jax.random.uniform(k1, (2, 1, 16, 16), dtype=jnp.float32)
    out1 = jax.block_until_ready(grad_layer(x1))
    assert out1.shape == (2, 1, 16, 16)
    assert jnp.allclose(out1, _reference(x1), atol=1e-5, rtol=1e-5)

    print("KERNEL_OK")
</pallas_src>

<mosaic_0001>
module attributes {stable_mosaic.version = 11 : i64} {
  func.func @_grad_kernel(%arg0: i32, %arg1: memref<2x768xf32, #tpu.memory_space<vmem>>, %arg2: memref<2x256xf32, #tpu.memory_space<vmem>>, %arg3: memref<2x256xf32, #tpu.memory_space<vmem>>, %arg4: memref<2x288xf32, #tpu.memory_space<vmem>>) attributes {dimension_semantics = [#tpu.dimension_semantics<parallel>], iteration_bounds = array<i64: 1>, scalar_prefetch = 0 : i64, scratch_operands = 1 : i64, tpu.core_type = #tpu.core_type<tc>, window_params = [{transform_indices = @transform_0, window_bounds = array<i64: 2, 768>}, {pipeline_mode = #tpu.pipeline_mode<synchronous>, transform_indices = @transform_1, window_bounds = array<i64: 2, 256>}, {transform_indices = @transform_2, window_bounds = array<i64: 2, 256>}]} {
    %c0 = arith.constant 0 : index
    %c0_0 = arith.constant 0 : index
    %0 = vector.load %arg1[%c0, %c0_0] : memref<2x768xf32, #tpu.memory_space<vmem>>, vector<2x256xf32>
    %cst = arith.constant 0.256789058 : f32
    %1 = vector.broadcast %cst : f32 to vector<2x256xf32>
    %2 = arith.mulf %0, %1 : vector<2x256xf32>
    %c0_1 = arith.constant 0 : index
    %c256 = arith.constant 256 : index
    %3 = vector.load %arg1[%c0_1, %c256] : memref<2x768xf32, #tpu.memory_space<vmem>>, vector<2x256xf32>
    %cst_2 = arith.constant 0.504128933 : f32
    %4 = vector.broadcast %cst_2 : f32 to vector<2x256xf32>
    %5 = arith.mulf %3, %4 : vector<2x256xf32>
    %6 = arith.addf %2, %5 : vector<2x256xf32>
    %c0_3 = arith.constant 0 : index
    %c512 = arith.constant 512 : index
    %7 = vector.load %arg1[%c0_3, %c512] : memref<2x768xf32, #tpu.memory_space<vmem>>, vector<2x256xf32>
    %cst_4 = arith.constant 0.0979062467 : f32
    %8 = vector.broadcast %cst_4 : f32 to vector<2x256xf32>
    %9 = arith.mulf %7, %8 : vector<2x256xf32>
    %10 = arith.addf %6, %9 : vector<2x256xf32>
    %cst_5 = arith.constant 0.000000e+00 : f32
    %11 = vector.broadcast %cst_5 : f32 to vector<2x16xf32>
    %c0_6 = arith.constant 0 : index
    %c0_7 = arith.constant 0 : index
    %12 = vector.load %arg4[%c0_6, %c0_7] : memref<2x288xf32, #tpu.memory_space<vmem>>, vector<2x16xf32>
    tpu.vector_store %arg4[%c0_6, %c0_7], %11 {strides = array<i32>} : memref<2x288xf32, #tpu.memory_space<vmem>>, vector<2x16xf32>,
    %c0_8 = arith.constant 0 : index
    %c272 = arith.constant 272 : index
    %13 = vector.load %arg4[%c0_8, %c272] : memref<2x288xf32, #tpu.memory_space<vmem>>, vector<2x16xf32>
    tpu.vector_store %arg4[%c0_8, %c272], %11 {strides = array<i32>} : memref<2x288xf32, #tpu.memory_space<vmem>>, vector<2x16xf32>,
    %c0_9 = arith.constant 0 : index
    %c16 = arith.constant 16 : index
    %14 = vector.load %arg4[%c0_9, %c16] : memref<2x288xf32, #tpu.memory_space<vmem>>, vector<2x256xf32>
    tpu.vector_store %arg4[%c0_9, %c16], %10 {strides = array<i32>} : memref<2x288xf32, #tpu.memory_space<vmem>>, vector<2x256xf32>,
    %c0_10 = arith.constant 0 : index
    %c0_11 = arith.constant 0 : index
    %15 = vector.load %arg4[%c0_10, %c0_11] : memref<2x288xf32, #tpu.memory_space<vmem>>, vector<2x256xf32>
    %c0_12 = arith.constant 0 : index
    %c32 = arith.constant 32 : index
    %16 = vector.load %arg4[%c0_12, %c32] : memref<2x288xf32, #tpu.memory_space<vmem>>, vector<2x256xf32>
    %17 = arith.subf %16, %15 : vector<2x256xf32>
    %c0_13 = arith.constant 0 : index
    %c17 = arith.constant 17 : index
    %18 = vector.load %arg4[%c0_13, %c17] : memref<2x288xf32, #tpu.memory_space<vmem>>, vector<2x256xf32>
    %c0_14 = arith.constant 0 : index
    %c0_15 = arith.constant 0 : index
    %19 = vector.load %arg2[%c0_14, %c0_15] : memref<2x256xf32, #tpu.memory_space<vmem>>, vector<1x256xf32>
    %20 = vector.broadcast %19 : vector<1x256xf32> to vector<2x256xf32>
    %21 = arith.mulf %18, %20 : vector<2x256xf32>
    %c0_16 = arith.constant 0 : index
    %c15 = arith.constant 15 : index
    %22 = vector.load %arg4[%c0_16, %c15] : memref<2x288xf32, #tpu.memory_space<vmem>>, vector<2x256xf32>
    %c1 = arith.constant 1 : index
    %c0_17 = arith.constant 0 : index
    %23 = vector.load %arg2[%c1, %c0_17] : memref<2x256xf32, #tpu.memory_space<vmem>>, vector<1x256xf32>
    %24 = vector.broadcast %23 : vector<1x256xf32> to vector<2x256xf32>
    %25 = arith.mulf %22, %24 : vector<2x256xf32>
    %26 = arith.subf %21, %25 : vector<2x256xf32>
    %27 = arith.mulf %17, %17 : vector<2x256xf32>
    %28 = arith.mulf %26, %26 : vector<2x256xf32>
    %29 = arith.addf %27, %28 : vector<2x256xf32>
    %cst_18 = arith.constant 9.99999997E-7 : f32
    %30 = vector.broadcast %cst_18 : f32 to vector<2x256xf32>
    %31 = arith.addf %29, %30 : vector<2x256xf32>
    %32 = math.sqrt %31 : vector<2x256xf32>
    %c0_19 = arith.constant 0 : index
    %c0_20 = arith.constant 0 : index
    %33 = vector.load %arg3[%c0_19, %c0_20] : memref<2x256xf32, #tpu.memory_space<vmem>>, vector<2x256xf32>
    tpu.vector_store %arg3[%c0_19, %c0_20], %32 {strides = array<i32>} : memref<2x256xf32, #tpu.memory_space<vmem>>, vector<2x256xf32>,
    return
  }
  func.func @transform_0(%arg0: i32) -> (i32, i32) {
    %c0_i32 = arith.constant 0 : i32
    %c0_i32_0 = arith.constant 0 : i32
    return %arg0, %c0_i32 : i32, i32
  }
  func.func @transform_1(%arg0: i32) -> (i32, i32) {
    %c0_i32 = arith.constant 0 : i32
    %c0_i32_0 = arith.constant 0 : i32
    %c0_i32_1 = arith.constant 0 : i32
    return %c0_i32, %c0_i32_0 : i32, i32
  }
  func.func @transform_2(%arg0: i32) -> (i32, i32) {
    %c0_i32 = arith.constant 0 : i32
    %c0_i32_0 = arith.constant 0 : i32
    return %arg0, %c0_i32 : i32, i32
  }
}

</mosaic_0001>

<bundles_post_ra>
// kernel: tpu_custom_call.1
= control target key start
LH: loop header
LB: loop body
LE: loop exit
PB: predicated region body
PF: predicated region fallthrough
CT: control target
= control target key end

     0   :  { %7 = vsyncpa [#allocation4], 0  ;;  %s322_s0 = inlined_call_operand.hbm [shape: f32[2,768], index: 0, kind: input, shape index: {}]   ;;  %s323_s1 = inlined_call_operand.hbm [shape: f32[2,256], index: 1, kind: input, shape index: {}]   ;;  %s324_s2 = inlined_call_operand.hbm [shape: f32[2,256], index: 2, kind: output, shape index: {}]  }
   0x1   :  { %8 = vsyncpa [#allocation7], 0 }
   0x2   :  { %9 = vsyncpa [#allocation5], 0  ;;  %s256_s9 = smov [#allocation3]   ;;  %s257_s11 = smov [#allocation6]  }
   0x3   :  { %s16_s10 = sshll.u32 %s256_s9, 4  ;;  %s26_s12 = sshll.u32 %s257_s11, 4  ;;  %s17_s10 = int_to_ptr.vmem [resolvable:$true] %s16_s10  ;;  %s27_s12 = int_to_ptr.vmem [resolvable:$true] %s26_s12 }
   0x4   :  { %s184_s15 = scalar_lea.hbm %s322_s0, 192 }
   0x5   :  { %p185_p0 = scmp.ne.s32.totalorder %s322_s0, %s184_s15  ;;  %p188_p1 = scmp.lt.u32.totalorder %s184_s15, %s322_s0 }
   0x7   :  { %p190_p2 = pnand %p188_p1, %p185_p0 }
   0x9   :  { %193 = shalt.err (!%p190_p2)
}
   0xa   :  { %s194_s20 = scalar_lea.vmem %s17_s10, 192  ;;  %p199_p4 = scmp.lt.s32.totalorder %s17_s10, %s17_s10 }
   0xb   :  { %p195_p3 = scmp.ne.s32.totalorder %s17_s10, %s194_s20  ;;  %p200_p5 = scmp.lt.s32.totalorder %s194_s20, %s194_s20 }
   0xd   :  { %p201_p6 = por %p200_p5, %p199_p4 }
   0xf   :  { %p202_p7 = pnand %p201_p6, %p195_p3 }
  0x11   :  { %205 = shalt.err (!%p202_p7)
}
  0x12   :  { %19 = dma.hbm_to_vmem [thread:$0]  %s322_s0, 192, %s17_s10, [#allocation4]  }
  0x13   :  { %s206_s25 = scalar_lea.hbm %s323_s1, 64 }
  0x14   :  { %p207_p8 = scmp.ne.s32.totalorder %s323_s1, %s206_s25  ;;  %p210_p9 = scmp.lt.u32.totalorder %s206_s25, %s323_s1 }
  0x16   :  { %p212_p10 = pnand %p210_p9, %p207_p8 }
  0x18   :  { %215 = shalt.err (!%p212_p10)
}
  0x19   :  { %s216_s30 = scalar_lea.vmem %s27_s12, 64  ;;  %p221_p12 = scmp.lt.s32.totalorder %s27_s12, %s27_s12 }
  0x1a   :  { %p217_p11 = scmp.ne.s32.totalorder %s27_s12, %s216_s30  ;;  %p222_p13 = scmp.lt.s32.totalorder %s216_s30, %s216_s30 }
  0x1c   :  { %p223_p0 = por %p222_p13, %p221_p12 }
  0x1e   :  { %p224_p1 = pnand %p223_p0, %p217_p11 }
  0x20   :  { %227 = shalt.err (!%p224_p1)
}
  0x21   :  { %29 = dma.hbm_to_vmem [thread:$0]  %s323_s1, 64, %s27_s12, [#allocation7]  }
  0x22   :  { %250 = dma.done.wait [#allocation4], 192  }
  0x23   :  { %251 = vsyncadd [#allocation4], 4294967104 }
  0x24   :  { %252 = dma.done.wait [#allocation7], 64  }
  0x25   :  { %253 = vsyncadd [#allocation7], 4294967232  ;;  %v73_v0 = vlaneseq  ;;  %v258_v1 = vmov 1983009808   ;;  %vm44_vm0 = vcmask 123904   ;;  %vm46_vm1 = vcmask 255104  }
  0x26   :  { %v83_v2 = vunpack.c.l.s4 %v258_v1  ;;  %v259_v4 = vmov 0.0   ;;  %v36_v8 = vld [vmem:[#allocation3] sm:$0xf]  ;;  %v38_v9 = vld [vmem:[#allocation3 + $0x4] sm:$0xf]  ;;  %s260_s1 = smov 16  }
  0x27   :  { %v74_v3 = vshrl.u32 %v73_v0, 7  ;;  %45 = vst.msk [vmem:[#allocation2] sm:$0x3] %vm44_vm0, %v259_v4  ;;  %v41_v10 = vld [vmem:[#allocation3 + $0x8] sm:$0xf]  ;;  %s261_s4 = smov 17  }
  0x28   :  { %47 = vst.msk [vmem:[#allocation2 + $0x4] sm:$0x3] %vm46_vm1, %v259_v4  ;;  %v84_v5 = vunpack.c.0.s8 %v83_v2  ;;  %v37_v11 = vmul.f32 0.25678906, %v36_v8  ;;  %v39_v12 = vmul.f32 0.50412893, %v38_v9 }
  0x29   :  { %v75_v6 = vsub.s32 0, %v74_v3  ;;  %v79_v7 = vsub.s32 1, %v74_v3  ;;  %v42_v13 = vmul.f32 0.09790625, %v41_v10  ;;  %s262_s5 = smov 15   ;;  %vm55_vm2 = vcmask 1041536  }
  0x2a   :  { %v87_v14 = vsub.s32 %v84_v5, %v74_v3  ;;  %v97_v15 = vld [vmem:[#allocation6 + $0x1] ss:$2 sm:$0x3]  ;;  %v71_v16 = vld [vmem:[#allocation6] ss:$2 sm:$0x3]  ;;  %v40_v17 = vadd.f32 %v39_v12, %v37_v11 }
  0x2b   :  { %v102_v18 = vrot.slane %v97_v15, %v75_v6  ;;  %v106_v19 = vrot.slane %v97_v15, %v79_v7  ;;  %v76_v20 = vrot.slane %v71_v16, %v75_v6  ;;  %v80_v21 = vrot.slane %v71_v16, %v79_v7  ;;  %s263_s6 = smov 32   ;;  %s264_s7 = smov 2  }
  0x2c   :  { %v43_v22 = vadd.f32 %v42_v13, %v40_v17  ;;  %vm56_vm3 = vcmask 1043458   ;;  %vm58_vm5 = vcmask 128004   ;;  %vm52_vm6 = vcmask 130048   ;;  %s265_s8 = smov 96   ;;  %s266_s9 = smov [#allocation8]  }
  0x2d   :  { %v107_v23 = vcombine.low %v102_v18, %v106_v19  ;;  %v81_v24 = vcombine.low %v76_v20, %v80_v21  ;;  %vm57_vm4 = vmor %vm56_vm3, %vm55_vm2  ;;  %vm118_vm8 = vcmask 121856   ;;  %vm92_vm9 = vcmask 138240   ;;  %s161_s10 = sshll.u32 %s266_s9, 4  ;;  %s162_s10 = int_to_ptr.vmem [resolvable:$true] %s161_s10 }
  0x2e   :  { %49 = vrot.lane.b32.xlu0 %v43_v22, %s260_s1  ;;  %vm59_vm7 = vmor %vm58_vm5, %vm57_vm4  ;;  %vm126_vm10 = vcmask 15360   ;;  %vm67_vm11 = vcmask 261120   ;;  %vm151_vm14 = vcmask 785408   ;;  %s228_s11 = scalar_lea.vmem %s162_s10, 64  ;;  %p233_p3 = scmp.lt.s32.totalorder %s162_s10, %s162_s10 }
  0x2f   :  { %v114_v25 = vrot.slane %v107_v23, %v87_v14  ;;  %v88_v26 = vrot.slane %v81_v24, %v87_v14  ;;  %p229_p2 = scmp.ne.s32.totalorder %s162_s10, %s228_s11  ;;  %p234_p4 = scmp.lt.s32.totalorder %s228_s11, %s228_s11 }
  0x31   :  { %89 = vrot.lane.b32.xlu1 %v88_v26, %s261_s4  ;;  %p235_p5 = por %p234_p4, %p233_p3 }
  0x32   :  { %115 = vrot.lane.b32.xlu0 %v114_v25, %s262_s5 }
  0x33   :  { %p236_p6 = pnand %p235_p5, %p229_p2 }
  0xa0   :  { %v50_v27 = vpop.permute.xlu0 %49 }
  0xa1   :  { %v51_v28 = vrot.slane %v50_v27, 6 }
  0xa3   :  { %v53_v29 = vsel %vm52_vm6, %v51_v28, %v50_v27  ;;  %v90_v36 = vpop.permute.xlu1 %89 }
  0xa4   :  { %60 = vst.msk [vmem:[#allocation2] sm:$0x3f] %vm59_vm7, %v53_v29  ;;  %v116_v30 = vpop.permute.xlu0 %115  ;;  %v91_v37 = vrot.slane %v90_v36, 6 }
  0xa5   :  { %v117_v31 = vrot.slane %v116_v30, 6 }
  0xa6   :  { %v93_v38 = vsel %vm92_vm9, %v91_v37, %v90_v36 }
  0xa7   :  { %v119_v33 = vsel %vm118_vm8, %v117_v31, %v116_v30 }
  0xab   :  { %v62_v32 = vld [vmem:[#allocation2] sm:$0x3f] }
  0xac   :  { %v61_v34 = vld [vmem:[#allocation2] sm:$0xf]  ;;  %v121_v35 = vmul.f32 %v119_v33, %v62_v32  ;;  %v95_v41 = vmul.f32 %v93_v38, %v62_v32 }
  0xad   :  { %64 = vrot.lane.b32.xlu0 %v61_v34, %s263_s6 }
  0xae   :  { %123 = vrot.lane.b32.xlu1 %v121_v35, %s264_s7 }
 0x11f   :  { %v65_v45 = vpop.permute.xlu0 %64 }
 0x120   :  { %v124_v39 = vpop.permute.xlu1 %123  ;;  %v66_v46 = vrot.slane %v65_v45, 6 }
 0x121   :  { %v125_v40 = vrot.slane %v124_v39, 6 }
 0x122   :  { %v68_v47 = vsel %vm67_vm11, %v66_v46, %v65_v45 }
 0x123   :  { %v127_v42 = vsel %vm126_vm10, %v125_v40, %v124_v39  ;;  %v70_v48 = vsub.f32 %v62_v32, %v68_v47 }
 0x124   :  { %v129_v43 = vsub.f32 %v95_v41, %v127_v42 }
 0x125   :  { %v130_v51 = vmul.f32 %v70_v48, %v70_v48 }
 0x126   :  { %v131_v44 = vmul.f32 %v129_v43, %v129_v43 }
 0x128   :  { %133 = vrot.lane.b32.xlu1 %v131_v44, %s262_s5 }
 0x19a   :  { %v134_v49 = vpop.permute.xlu1 %133 }
 0x19b   :  { %v135_v50 = vrot.slane %v134_v49, 6 }
 0x19d   :  { %v136_v52 = vsel %vm118_vm8, %v135_v50, %v134_v49 }
 0x19e   :  { %v138_v53 = vadd.f32 %v136_v52, %v130_v51 }
 0x1a0   :  { %v139_v54 = vadd.f32 1e-06, %v138_v53 }
 0x1a2   :  { %182 = vrsqrt.f32 %v139_v54  ;;  %vm142_vm12 = vcmp.eq.f32.partialorder %v139_v54, inf  ;;  %v145_v57 = vand.u32 2147483648, %v139_v54  ;;  %vm144_vm13 = vcmp.eq.f32.partialorder %v139_v54, 0.0 }
 0x1ac   :  { %v183_v55 = vpop.eup %182 }
 0x1ad   :  { %v141_v56 = vmul.f32 %v183_v55, %v139_v54 }
 0x1af   :  { %v143_v58 = vsel %vm142_vm12, %v139_v54, %v141_v56 }
 0x1b0   :  { %v146_v59 = vsel %vm144_vm13, %v145_v57, %v143_v58 }
 0x1b1   :  { %148 = vrot.lane.b32.xlu0 %v146_v59, %s265_s8 }
 0x223   :  { %v149_v60 = vpop.permute.xlu0 %148 }
 0x224   :  { %v150_v61 = vrot.slane %v149_v60, 2 }
 0x226   :  { %v152_v62 = vsel %vm151_vm14, %v149_v60, %v150_v61 }
 0x227   :  { %154 = vst [vmem:[#allocation8] sm:$0xf] %v152_v62 }
 0x228   :  { %239 = shalt.err (!%p236_p6)
}
 0x229   :  { %s240_s14 = scalar_lea.hbm %s324_s2, 64 }
 0x22a   :  { %p241_p7 = scmp.ne.s32.totalorder %s324_s2, %s240_s14  ;;  %p244_p8 = scmp.lt.u32.totalorder %s240_s14, %s324_s2 }
 0x22c   :  { %p246_p9 = pnand %p244_p8, %p241_p7 }
 0x22e   :  { %249 = shalt.err (!%p246_p9)
}
 0x22f   :  { %164 = dma.vmem_to_hbm [thread:$0]  %s162_s10, 64, %s324_s2, [#allocation5]  }
 0x230   :  { %254 = dma.done.wait [#allocation5], 64  }
 0x231   :  { %255 = vsyncadd [#allocation5], 4294967232 }
 0x232   :  { %168 = vsyncpa [#allocation4], 1 }
 0x233   :  { %169 = vsyncpa [#allocation7], 1 }
 0x234   :  { %170 = vsyncpa [#allocation5], 1 }

</bundles_post_ra>
